<compile_context>
chip_gen: v7x
topology: tpu7x:2x2x1
jax: 0.10.0
libtpu: 0.0.40
codegen_flags: <defaults>
</compile_context>

<pallas_src>
import math

import jax
import jax.numpy as jnp
from jax.experimental import pallas as pl
from jax.experimental.pallas import tpu as pltpu

LANE = 128
SUBLANE = 8


def _round_up(x, m):
    return ((x + m - 1) // m) * m


# ---------------------------------------------------------------------------
# Pass 0:  XW = X @ W1      (tiny; removes per-row-block recompute in pass 1)
# ---------------------------------------------------------------------------
def _xw_kernel(x_ref, w1_ref, xw_ref):
    xw_ref[...] = jnp.dot(x_ref[...], w1_ref[...],
                          preferred_element_type=jnp.float32).astype(jnp.bfloat16)


# ---------------------------------------------------------------------------
# Pass 1 (single sweep of A_hat):
#   G  = relu(A_hat @ XW + b1) @ W2          (layer 1 + fused layer-2 feature transform)
#   PA = pool @ A_hat                        (accumulated per column block of A)
# ---------------------------------------------------------------------------
def _make_gcn1_kernel(xw_resident, tile_k):
    def kernel(a_ref, xw_ref, b1_ref, w2_ref, pool_ref, g_ref, pa_ref, acc_ref):
        i = pl.program_id(0)
        k = pl.program_id(1)

        @pl.when((i == 0) & (k == 0))
        def _():
            pa_ref[...] = jnp.zeros_like(pa_ref)          # grid-wide PA accumulator

        @pl.when(k == 0)
        def _():
            acc_ref[...] = jnp.zeros_like(acc_ref)        # per-row-block H1 accumulator

        a = a_ref[...]                                    # bf16 A_hat tile
        if xw_resident:
            row = pl.multiple_of(k * tile_k, tile_k)
            xw = xw_ref[pl.ds(row, tile_k), :]            # slice of VMEM-resident XW
        else:
            xw = xw_ref[...]                              # streamed XW tile

        # Layer-1 aggregation: acc += A[i, k] @ (X @ W1)[k]   (f32 accumulation)
        acc_ref[...] += jnp.dot(a, xw, preferred_element_type=jnp.float32)

        # Pooled adjacency: PA[:, cols_k] += pool[:, rows_i] @ A[i, k]
        pa_ref[k] = pa_ref[k] + jnp.dot(pool_ref[...], a,
                                        preferred_element_type=jnp.float32)

        @pl.when(k == pl.num_programs(1) - 1)
        def _():
            h1 = jnp.maximum(acc_ref[...] + b1_ref[...], 0.0)   # bias + ReLU in f32
            # Dropout(dp_rate) -> identity at inference time.
            # Fuse the second GCN layer's feature transform (H1 @ W2).
            g_ref[...] = jnp.dot(h1.astype(jnp.bfloat16), w2_ref[...],
                                 preferred_element_type=jnp.float32).astype(jnp.bfloat16)

    return kernel


# ---------------------------------------------------------------------------
# Pass 2 (cheap):  pooled = PA @ G + b2 ; out = pooled @ W_head + b_head
# ---------------------------------------------------------------------------
def _pool_head_kernel(pa_ref, g_ref, b2_ref, wh_ref, bh_ref, out_ref, pooled_ref):
    j = pl.program_id(0)

    @pl.when(j == 0)
    def _():
        pooled_ref[...] = jnp.zeros_like(pooled_ref)

    pooled_ref[...] += jnp.dot(pa_ref[0], g_ref[...].astype(jnp.float32),
                               preferred_element_type=jnp.float32)

    @pl.when(j == pl.num_programs(0) - 1)
    def _():
        # pool rows sum to 1 (mean pool)  ->  pool @ (1 * b2) == b2 per graph.
        pooled = pooled_ref[...] + b2_ref[...]
        # Dropout(dp_rate_linear) -> identity at inference time.  Linear head fused here.
        out_ref[...] = (jnp.dot(pooled.astype(jnp.bfloat16), wh_ref[...],
                                preferred_element_type=jnp.float32) + bh_ref[...])


def graph_gnn_forward(a_hat, x, w1, b1, w2, b2, pool, w_head, b_head,
                      *, tile_m=256, tile_k=256):
    """Forward pass of GraphGNNModel (eval mode). Returns [B, c_out] float32.

    Tile sizes must be multiples of 128 (lane width).  Defaults of 256 suit v5e/v6e;
    on v7x (64 MiB VMEM) they still fit comfortably for moderate N.
    """
    assert tile_m % LANE == 0 and tile_k % LANE == 0, "tiles must be multiples of 128"

    N, c_in = x.shape
    c_hidden = w1.shape[1]
    c_out = w_head.shape[1]
    B = pool.shape[0]

    blk = math.lcm(tile_m, tile_k)
    n_pad = _round_up(N, blk)
    h_pad = _round_up(c_hidden, LANE)
    o_pad = _round_up(c_out, LANE)
    b_pad = _round_up(B, SUBLANE)

    grid_m = n_pad // tile_m
    grid_k = n_pad // tile_k

    def pad2(arr, rows, cols, dtype):
        return jnp.pad(arr, ((0, rows - arr.shape[0]),
                             (0, cols - arr.shape[1]))).astype(dtype)

    bf16 = jnp.bfloat16
    a_p = pad2(a_hat, n_pad, n_pad, bf16)        # zero-padded rows/cols -> exact math
    x_p = pad2(x, n_pad, c_in, bf16)
    w1_p = pad2(w1, c_in, h_pad, bf16)
    b1_p = pad2(b1, 1, h_pad, jnp.float32)
    w2_p = pad2(w2, h_pad, h_pad, bf16)
    b2_p = pad2(b2, 1, h_pad, jnp.float32)
    pool_p = pad2(pool, b_pad, n_pad, bf16)      # zero cols for padded nodes / rows for padded graphs
    wh_p = pad2(w_head, h_pad, o_pad, bf16)
    bh_p = pad2(b_head, 1, o_pad, jnp.float32)

    vmem_limit = 32 * 1024 * 1024

    # ---- pass 0: XW = X @ W1 (tiny, streamed over node rows) ----
    xw = pl.pallas_call(
        _xw_kernel,
        out_shape=jax.ShapeDtypeStruct((n_pad, h_pad), bf16),
        grid_spec=pltpu.PrefetchScalarGridSpec(
            num_scalar_prefetch=0,
            grid=(grid_k,),
            in_specs=[
                pl.BlockSpec((tile_k, c_in), lambda i: (i, 0)),    # X rows
                pl.BlockSpec((c_in, h_pad), lambda i: (0, 0)),     # W1 (resident)
            ],
            out_specs=pl.BlockSpec((tile_k, h_pad), lambda i: (i, 0)),
        ),
        compiler_params=pltpu.CompilerParams(
            dimension_semantics=("parallel",),
            vmem_limit_bytes=vmem_limit,
        ),
    )(x_p, w1_p)

    # Keep XW fully VMEM-resident in pass 1 when it fits (one DMA instead of a
    # re-fetch per row block); otherwise stream it per k-tile.
    xw_resident = 2 * (n_pad * h_pad * 2) <= 8 * 1024 * 1024
    xw_spec = (pl.BlockSpec((n_pad, h_pad), lambda i, k: (0, 0)) if xw_resident
               else pl.BlockSpec((tile_k, h_pad), lambda i, k: (k, 0)))

    # ---- pass 1: single sweep of A_hat -> G and PA ----
    xw_bytes = 2 * n_pad * h_pad * (1 if xw_resident else grid_m)
    cost1 = pl.CostEstimate(
        flops=(2 * n_pad * n_pad * h_pad          # A @ XW
               + 2 * b_pad * n_pad * n_pad        # pool @ A
               + 2 * n_pad * h_pad * h_pad),      # H1 @ W2
        transcendentals=0,
        bytes_accessed=(2 * n_pad * n_pad + xw_bytes + 2 * b_pad * n_pad
                        + 2 * n_pad * h_pad + 4 * n_pad * b_pad),
    )
    g, pa = pl.pallas_call(
        _make_gcn1_kernel(xw_resident, tile_k),
        out_shape=(jax.ShapeDtypeStruct((n_pad, h_pad), bf16),
                   jax.ShapeDtypeStruct((grid_k, b_pad, tile_k), jnp.float32)),
        grid_spec=pltpu.PrefetchScalarGridSpec(
            num_scalar_prefetch=0,
            grid=(grid_m, grid_k),
            in_specs=[
                pl.BlockSpec((tile_m, tile_k), lambda i, k: (i, k)),   # A_hat tile
                xw_spec,                                               # XW (resident/stream)
                pl.BlockSpec((1, h_pad), lambda i, k: (0, 0)),         # b1 (resident)
                pl.BlockSpec((h_pad, h_pad), lambda i, k: (0, 0)),     # W2 (resident)
                pl.BlockSpec((b_pad, tile_m), lambda i, k: (0, i)),    # pool columns
            ],
            out_specs=[
                pl.BlockSpec((tile_m, h_pad), lambda i, k: (i, 0)),             # G
                pl.BlockSpec((grid_k, b_pad, tile_k), lambda i, k: (0, 0, 0)),  # PA (resident acc)
            ],
            scratch_shapes=[pltpu.VMEM((tile_m, h_pad), jnp.float32)],
        ),
        compiler_params=pltpu.CompilerParams(
            # PA accumulates across both grid axes -> no megacore split here.
            dimension_semantics=("arbitrary", "arbitrary"),
            vmem_limit_bytes=vmem_limit,
        ),
        cost_estimate=cost1,
    )(a_p, xw, b1_p, w2_p, pool_p)

    # ---- pass 2: pooled = PA @ G + b2, then linear head (H2 never materialized) ----
    out_pad = pl.pallas_call(
        _pool_head_kernel,
        out_shape=jax.ShapeDtypeStruct((b_pad, o_pad), jnp.float32),
        grid_spec=pltpu.PrefetchScalarGridSpec(
            num_scalar_prefetch=0,
            grid=(grid_k,),
            in_specs=[
                pl.BlockSpec((1, b_pad, tile_k), lambda j: (j, 0, 0)),  # PA block
                pl.BlockSpec((tile_k, h_pad), lambda j: (j, 0)),        # G block
                pl.BlockSpec((1, h_pad), lambda j: (0, 0)),             # b2 (resident)
                pl.BlockSpec((h_pad, o_pad), lambda j: (0, 0)),         # W_head (resident)
                pl.BlockSpec((1, o_pad), lambda j: (0, 0)),             # b_head (resident)
            ],
            out_specs=pl.BlockSpec((b_pad, o_pad), lambda j: (0, 0)),
            scratch_shapes=[pltpu.VMEM((b_pad, h_pad), jnp.float32)],
        ),
        compiler_params=pltpu.CompilerParams(
            dimension_semantics=("arbitrary",),
            vmem_limit_bytes=vmem_limit,
        ),
    )(pa, g, b2_p, wh_p, bh_p)

    return out_pad[:B, :c_out]


# ---------------------------------------------------------------------------
# Host-side glue (graph preprocessing; plain JAX, outside the kernels)
# ---------------------------------------------------------------------------
def build_normalized_adjacency(edge_index, num_nodes):
    """Dense A_hat = D^{-1/2} (A + I) D^{-1/2} (PyG GCNConv default, self-loops)."""
    src, dst = edge_index[0], edge_index[1]
    A = jnp.zeros((num_nodes, num_nodes), jnp.float32).at[dst, src].add(1.0)
    A = A + jnp.eye(num_nodes, dtype=jnp.float32)
    deg = A.sum(axis=1)
    dinv = 1.0 / jnp.sqrt(deg)
    return dinv[:, None] * A * dinv[None, :]


def build_mean_pool_matrix(batch_idx, num_graphs, num_nodes):
    """P[b, n] = 1/|graph b| if batch_idx[n] == b else 0  (rows sum to 1)."""
    onehot = (batch_idx[None, :] == jnp.arange(num_graphs)[:, None]).astype(jnp.float32)
    counts = jnp.maximum(onehot.sum(axis=1, keepdims=True), 1.0)
    return onehot / counts


if __name__ == "__main__":
    # Small synthetic problem: 2 graphs, each a 96-node undirected ring
    # (N=192 nodes -> padded to 256, exercising a (2, 2) grid with 128-tiles).
    ring = 96
    B = 2
    N = B * ring
    c_in = 8
    c_hidden = 32
    c_out = 4

    key = jax.random.PRNGKey(0)
    k_x, k_w1, k_b1, k_w2, k_b2, k_wh, k_bh = jax.random.split(key, 7)

    # Node features [N, c_in]
    x = jax.random.normal(k_x, (N, c_in), dtype=jnp.float32)

    # Edge index: undirected rings (PyG [2, E] convention).
    edges = []
    for g in range(B):
        base = g * ring
        for i in range(ring):
            a, b = base + i, base + (i + 1) % ring
            edges.append((a, b))
            edges.append((b, a))
    edge_index = jnp.array(edges, dtype=jnp.int32).T  # [2, E]

    # Batch assignment per node.
    batch_idx = jnp.concatenate(
        [jnp.full((ring,), g, jnp.int32) for g in range(B)])

    # Deterministic synthetic parameters (shapes per module __init__).
    w1 = jax.random.normal(k_w1, (c_in, c_hidden), jnp.float32) * 0.1       # GCNConv 1
    b1 = jax.random.normal(k_b1, (1, c_hidden), jnp.float32) * 0.1
    w2 = jax.random.normal(k_w2, (c_hidden, c_hidden), jnp.float32) * 0.1   # GCNConv 2
    b2 = jax.random.normal(k_b2, (1, c_hidden), jnp.float32) * 0.1
    w_head = jax.random.normal(k_wh, (c_hidden, c_out), jnp.float32) * 0.1  # Linear head
    b_head = jax.random.normal(k_bh, (1, c_out), jnp.float32) * 0.1

    # Glue: dense normalized adjacency + mean-pool operator.
    a_hat = build_normalized_adjacency(edge_index, N)
    pool = build_mean_pool_matrix(batch_idx, B, N)

    out = graph_gnn_forward(a_hat, x, w1, b1, w2, b2, pool, w_head, b_head,
                            tile_m=128, tile_k=128)
    out = jax.block_until_ready(out)

    # Pure-JAX f32 reference of the same math.
    h1_ref = jnp.maximum(a_hat @ (x @ w1) + b1, 0.0)
    h2_ref = a_hat @ (h1_ref @ w2) + b2
    ref = pool @ h2_ref @ w_head + b_head

    assert out.shape == (B, c_out)
    # bf16 MXU inputs with f32 accumulation -> loose-ish tolerance vs f32 reference.
    assert jnp.allclose(out, ref, atol=2e-2, rtol=2e-2), (out, ref)

    print("KERNEL_OK")
</pallas_src>

<mosaic_0001>
module attributes {stable_mosaic.version = 11 : i64} {
  func.func @_xw_kernel(%arg0: i32, %arg1: memref<128x8xbf16, #tpu.memory_space<vmem>>, %arg2: memref<8x128xbf16, #tpu.memory_space<vmem>>, %arg3: memref<128x128xbf16, #tpu.memory_space<vmem>>) attributes {dimension_semantics = [#tpu.dimension_semantics<parallel>], iteration_bounds = array<i64: 2>, scalar_prefetch = 0 : i64, scratch_operands = 0 : i64, tpu.core_type = #tpu.core_type<tc>, window_params = [{transform_indices = @transform_0, window_bounds = array<i64: 128, 8>}, {pipeline_mode = #tpu.pipeline_mode<synchronous>, transform_indices = @transform_1, window_bounds = array<i64: 8, 128>}, {transform_indices = @transform_2, window_bounds = array<i64: 128, 128>}]} {
    %c0 = arith.constant 0 : index
    %c0_0 = arith.constant 0 : index
    %0 = vector.load %arg1[%c0, %c0_0] : memref<128x8xbf16, #tpu.memory_space<vmem>>, vector<128x8xbf16>
    %c0_1 = arith.constant 0 : index
    %c0_2 = arith.constant 0 : index
    %1 = vector.load %arg2[%c0_1, %c0_2] : memref<8x128xbf16, #tpu.memory_space<vmem>>, vector<8x128xbf16>
    %cst = arith.constant dense<0.000000e+00> : vector<128x128xf32>
    %2 = tpu.matmul %0, %1, %cst {dimension_numbers = #tpu.dot_dimension_numbers<[1], [0], [0], [1], [0, 0, 1, 1], [], []>} : vector<128x8xbf16>, vector<8x128xbf16>, vector<128x128xf32> -> vector<128x128xf32>
    %3 = arith.truncf %2 : vector<128x128xf32> to vector<128x128xbf16>
    %c0_3 = arith.constant 0 : index
    %c0_4 = arith.constant 0 : index
    %4 = vector.load %arg3[%c0_3, %c0_4] : memref<128x128xbf16, #tpu.memory_space<vmem>>, vector<128x128xbf16>
    tpu.vector_store %arg3[%c0_3, %c0_4], %3 {strides = array<i32>} : memref<128x128xbf16, #tpu.memory_space<vmem>>, vector<128x128xbf16>,
    return
  }
  func.func @transform_0(%arg0: i32) -> (i32, i32) {
    %c0_i32 = arith.constant 0 : i32
    %c0_i32_0 = arith.constant 0 : i32
    return %arg0, %c0_i32 : i32, i32
  }
  func.func @transform_1(%arg0: i32) -> (i32, i32) {
    %c0_i32 = arith.constant 0 : i32
    %c0_i32_0 = arith.constant 0 : i32
    %c0_i32_1 = arith.constant 0 : i32
    return %c0_i32, %c0_i32_0 : i32, i32
  }
  func.func @transform_2(%arg0: i32) -> (i32, i32) {
    %c0_i32 = arith.constant 0 : i32
    %c0_i32_0 = arith.constant 0 : i32
    return %arg0, %c0_i32 : i32, i32
  }
}

</mosaic_0001>

<bundles_post_ra>
// kernel: tpu_custom_call.1
= control target key start
LH: loop header
LB: loop body
LE: loop exit
PB: predicated region body
PF: predicated region fallthrough
CT: control target
= control target key end

     0   :  { %7 = vsyncpa [#allocation3], 0  ;;  %s872_s0 = inlined_call_operand.vmem [shape: bf16[256,8], index: 0, kind: input, shape index: {}]   ;;  %s873_s1 = inlined_call_operand.vmem [shape: bf16[8,128], index: 1, kind: input, shape index: {}]   ;;  %s874_s2 = inlined_call_operand.hbm [shape: bf16[256,128], index: 2, kind: output, shape index: {}]  }
   0x1   :  { %9 = vsyncpa [#allocation3 + $0x1], 0  ;;  %s755_s9 = smov 0   ;;  %s757_s10 = smov 0  }
   0x2   :  { %s759_s11 = smov 0   ;;  %s761_s12 = smov 0  }
   0x3 LB: > { %s776_s13 = sadd.s32 4294967295, %s735_s12   ;;  %s485_s14 = sadd.s32 4294967294, %s735_s12   ;;  %s735_s12 = sphi %s761_s12, %s880_s12   ;;  %s731_s11 = sphi %s759_s11, %s879_s11   ;;  %s727_s10 = sphi %s757_s10, %s878_s10   ;;  %s723_s9 = sphi %s755_s9, %s877_s9  }
   0x4   : > { %s780_s15 = sadd.s32 1, %s735_s12   ;;  %s69_s16 = sadd.s32 1, %s731_s11 }
   0x5   : > { %s66_s17 = ssub.s32 %s735_s12, %s780_s15  ;;  %p79_p0 = scmp.ne.s32.totalorder %s731_s11, %s727_s10 }
   0x6   : > { %p67_p1 = scmp.eq.s32.totalorder %s66_s17, 0  ;;  %p80_p2 = scmp.eq.s32.totalorder %s776_s13, 1 }
   0x7   : > { %p85_p3 = scmp.ne.s32.totalorder %s727_s10, %s723_s9  ;;  %p86_p4 = scmp.eq.s32.totalorder %s485_s14, 1 }
   0x8   : > { %s791_s18 = scalar_select %p67_p1, %s731_s11, %s69_s16  }
   0x9   : > { %p793_p5 = por %p80_p2, %p79_p0  ;;  %p797_p6 = por %p86_p4, %p85_p3 }
   0xa   : > { %p488_p7 = scmp.ge.s32.totalorder %s735_s12, 1  ;;  %p116_p8 = scmp.lt.s32.totalorder %s735_s12, 3 }
   0xc   : > { %p117_p9 = pnand %p488_p7, %p116_p8 }
   0xd   : > { %v162_v0 = vld [vmem:[%s873_s1] sm:$0xf] (!%p117_p9)  ;;  %vm228_vm0 = vcmask (!%p117_p9), 1043456   ;;  %s490_s23 = sshll.u32 (!%p117_p9), %s776_s13, 4  ;;  %vm203_vm1 = vcmask (!%p117_p9), 64512   ;;  %s135_s28 = sand.u32 (!%p117_p9), 1, %s727_s10  }
   0xe   : > { %120 = sbr.rel (%p117_p9) target bundleno = 267 (0x10b), region = 28  ;;  %622 = vmatprep.subr.msk.bf16.mxu0 (!%p117_p9), %vm228_vm0, %v162_v0  ;;  %623 = vmatprep.subr.msk.bf16.mxu1 (!%p117_p9), %vm228_vm0, %v162_v0  ;;  %v230_v1 = vsel (!%p117_p9), %vm228_vm0, %v162_v0, 0  ;;  %p139_p10 = scmp.lt.s32.totalorder (!%p117_p9), %s490_s23, 31 }
   0xf   : > { %603 = vmatpush3.bf16.msra.mxu0 (!%p117_p9), %v230_v1  ;;  %621 = vmatpush3.bf16.msra.mxu1 (!%p117_p9), %v230_v1  ;;  %s489_s29 = sshll.u32 (!%p117_p9), %s135_s28, 6  ;;  %s545_s3 = sshll.u32 (!%p117_p9), %s776_s13, 10 }
  0x10   : > { %s137_s30 = scalar_lea.vmem (!%p117_p9), [#allocation2], %s489_s29  ;;  %s825_s7 = scalar_lea.hbm (!%p117_p9), %s874_s2, %s545_s3 }
  0x11   : > { %s423_s4 = sshll.u32 (!%p117_p9), %s137_s30, 4  ;;  %s831_s8 = scalar_lea.sflag (!%p117_p9), [#allocation3], %s135_s28  ;;  %s827_s4 = int_to_ptr.vmem [resolvable:$true] %s423_s4 }
  0x12   : > { %s673_s13 = scalar_lea.vmem (!%p117_p9), %s827_s4, 1024  ;;  %s737_s14 = smov (!%p117_p9), [#allocation2]  }
  0x13   : > { %p674_p11 = scmp.ne.s32.totalorder (!%p117_p9), %s827_s4, %s673_s13  ;;  %s677_s16 = sshll.u32 (!%p117_p9), %s737_s14, 4  ;;  %s678_s16 = int_to_ptr.vmem [resolvable:$false] %s677_s16 }
  0x14   : > { %s679_s17 = scalar_lea.vmem (!%p117_p9), %s678_s16, 2048  ;;  %p680_p0 = scmp.lt.s32.totalorder (!%p117_p9), %s827_s4, %s678_s16 }
  0x15   : > { %s882_s23 = smov (!%p139_p10, %s490_s23), 31  ;;  %p675_p12 = pnand %p674_p11, %p793_p5 }
  0x16   : > { %s491_s24 = sshll.u32 %s882_s23, 2  ;;  %p681_p1 = scmp.lt.s32.totalorder %s679_s17, %s673_s13 }
  0x17   : > { %s142_s27 = scalar_lea.vmem %s872_s0, %s491_s24  ;;  %p676_p13 = pneg %p675_p12 }
  0x18   : > { %v665_v2 = vld [vmem:[%s142_s27] sm:$0xff]   ;;  %v667_v4 = vld [vmem:[%s142_s27 + $0x8] sm:$0xff]   ;;  %v669_v6 = vld [vmem:[%s142_s27 + $0x10] sm:$0xff]   ;;  %p682_p2 = por %p681_p1, %p680_p0 }
  0x19   : > { %v666_v3 = vld [vmem:[%s142_s27 + $0x20] sm:$0xff]   ;;  %604 = vmatprep.mubr.msk.bf16.mxu0 %vm203_vm1, %v665_v2  ;;  %v668_v5 = vld [vmem:[%s142_s27 + $0x28] sm:$0xff]   ;;  %v670_v7 = vld [vmem:[%s142_s27 + $0x30] sm:$0xff]  }
  0x1a   : > { %612 = vmatprep.mubr.msk.bf16.mxu1 %vm203_vm1, %v666_v3  ;;  %605 = vmatmul.mubr.msk.bf16.vlgmr.msra.gmra.mrb[0].mxu0 %vm203_vm1, %v667_v4  ;;  %v671_v8 = vld [vmem:[%s142_s27 + $0x18] sm:$0xff]   ;;  %p683_p3 = pnand %p682_p2, %p676_p13 }
  0x1b   : > { %613 = vmatmul.mubr.msk.bf16.vlgmr.msra.gmra.mrb[0].mxu1 %vm203_vm1, %v668_v5  ;;  %608 = vmatprep.mubr.msk.bf16.mxu0 %vm203_vm1, %v669_v6  ;;  %v672_v9 = vld [vmem:[%s142_s27 + $0x38] sm:$0xff]  }
  0x1c   : > { %616 = vmatprep.mubr.msk.bf16.mxu1 %vm203_vm1, %v670_v7 }
  0x22   : > { %609 = vmatmul.mubr.msk.bf16.gmra.mrb[4].mxu0 %vm203_vm1, %v671_v8 }
  0x23   : > { %617 = vmatmul.mubr.msk.bf16.gmra.mrb[4].mxu1 %vm203_vm1, %v672_v9 }
  0xed   : > { %v606_v10 = vpop.f32.mrb[0].mxu0 }
  0xee   : > { %v614_v11 = vpop.f32.mrb[0].mxu1  ;;  %v266_v12 = vpop.f32.mrb[1].mxu0 }
  0xef   : > { %v298_v13 = vpop.f32.mrb[1].mxu1  ;;  %v607_v14 = vpop.f32.mrb[2].mxu0 }
  0xf0   : > { %v554_v15 = vpack.c.bf16 %v607_v14, %v606_v10  ;;  %v615_v16 = vpop.f32.mrb[2].mxu1  ;;  %v269_v17 = vpop.f32.mrb[3].mxu0 }
  0xf1   : > { %v574_v18 = vpack.c.bf16 %v615_v16, %v614_v11  ;;  %v549_v19 = vpack.c.bf16 %v269_v17, %v266_v12  ;;  %v301_v20 = vpop.f32.mrb[3].mxu1 }
  0xf2   : > { %586 = vst [vmem:[%s137_s30 + $0x8] sm:$0xff] %v554_v15   ;;  %v569_v21 = vpack.c.bf16 %v301_v20, %v298_v13 }
  0xf3   : > { %590 = vst [vmem:[%s137_s30 + $0x28] sm:$0xff] %v574_v18   ;;  %550 = vst [vmem:[%s137_s30] sm:$0xff] %v549_v19  }
  0xf4   : > { %589 = vst [vmem:[%s137_s30 + $0x20] sm:$0xff] %v569_v21  }
  0xf5   : > { %v610_v22 = vpop.f32.mrb[4].mxu0 }
  0xf6   : > { %v618_v23 = vpop.f32.mrb[4].mxu1  ;;  %v282_v24 = vpop.f32.mrb[5].mxu0 }
  0xf7   : > { %v314_v25 = vpop.f32.mrb[5].mxu1  ;;  %v611_v26 = vpop.f32.mrb[6].mxu0 }
  0xf8   : > { %v564_v27 = vpack.c.bf16 %v611_v26, %v610_v22  ;;  %v619_v28 = vpop.f32.mrb[6].mxu1  ;;  %v285_v29 = vpop.f32.mrb[7].mxu0 }
  0xf9   : > { %v584_v30 = vpack.c.bf16 %v619_v28, %v618_v23  ;;  %v559_v31 = vpack.c.bf16 %v285_v29, %v282_v24  ;;  %v317_v32 = vpop.f32.mrb[7].mxu1 }
  0xfa   : > { %588 = vst [vmem:[%s137_s30 + $0x18] sm:$0xff] %v564_v27   ;;  %v579_v33 = vpack.c.bf16 %v317_v32, %v314_v25 }
  0xfb   : > { %592 = vst [vmem:[%s137_s30 + $0x38] sm:$0xff] %v584_v30   ;;  %587 = vst [vmem:[%s137_s30 + $0x10] sm:$0xff] %v559_v31  }
  0xfc   : > { %591 = vst [vmem:[%s137_s30 + $0x30] sm:$0xff] %v579_v33  }
  0xfd   : > { %686 = shalt.err (!%p683_p3)
}
  0xfe   : > { %s687_s21 = scalar_lea.hbm %s825_s7, 1024  ;;  %s691_s24 = scalar_lea.hbm %s874_s2, 2048 }
  0xff   : > { %p688_p4 = scmp.ne.s32.totalorder %s825_s7, %s687_s21  ;;  %p692_p9 = scmp.lt.u32.totalorder %s825_s7, %s874_s2 }
 0x100   : > { %p693_p10 = scmp.lt.u32.totalorder %s691_s24, %s687_s21  ;;  %p695_p12 = scmp.lt.u32.totalorder %s687_s21, %s825_s7 }
 0x101   : > { %p689_p7 = pnand %p688_p4, %p793_p5 }
 0x102   : > { %p694_p11 = por %p693_p10, %p692_p9 }
 0x103   : > { %p690_p8 = pneg %p689_p7 }
 0x104   : > { %p696_p13 = por %p695_p12, %p694_p11 }
 0x106   : > { %p697_p0 = pnand %p696_p13, %p690_p8 }
 0x108   : > { %700 = shalt.err (!%p697_p0)
}
 0x109   : > { %s738_s27 = smov 64   ;;  %s739_s28 = smov 4  }
 0x10a   : > { %624 = dma.vmem_to_hbm [thread:$0]  (%p793_p5), %s827_s4, 1024, %s825_s7, %s831_s8, %s738_s27, %s738_s27, %s739_s28  }
 0x10b PF: > { %p630_p1 = scmp.ge.s32.totalorder %s735_s12, 2  ;;  %s438_s29 = sand.u32 1, %s723_s9  }
 0x10c   : > { %s439_s30 = scalar_lea.sflag [#allocation3], %s438_s29 }
 0x10d   : > { %p627_p2 = pnand %p630_p1, %p797_p6 }
 0x10f   : > { %718 = dma.done.wait (!%p627_p2), %s439_s30, 1024  }
 0x110   : > { %720 = vsyncadd (!%p627_p2), %s439_s30, 4294966272  ;;  %p12_p3 = scmp.ge.s32.totalorder %s780_s15, 4   ;;  %s877_s9 = smov %s727_s10 }
 0x111   : > { %s878_s10 = smov %s731_s11  ;;  %s879_s11 = smov %s791_s18 }
 0x112   : > { %s880_s12 = smov %s780_s15  ;;  %14 = sbr.rel (!%p12_p3) target bundleno = 3 (0x3), region = 63 }
 0x119   :  { %444 = vsyncpa [#allocation3], 1 }
 0x11a   :  { %446 = vsyncpa [#allocation3 + $0x1], 1 }

</bundles_post_ra>
